<compile_context>
chip_gen: v5e
topology: v5e:2x2
jax: 0.10.0
libtpu: 0.0.40
codegen_flags: <defaults>
</compile_context>

<pallas_src>
import functools

import jax
import jax.numpy as jnp
from jax.experimental import pallas as pl
from jax.experimental.pallas import tpu as pltpu

_LANE = 128

# --------------------------------------------------------------- VMEM budgeting
try:
    _VMEM_CAP = int(pltpu.get_tpu_info().vmem_capacity_bytes)
except Exception:  # pragma: no cover - fallback if hw query unavailable
    _VMEM_CAP = 64 * 1024 * 1024  # conservative (v7x per-TensorCore VMEM)

# Gridless single-block path needs ~2 VMEM windows (z in + f out): route arrays up to
# ~3/8 of VMEM capacity there (~48 MiB on v5e/v6e's 128 MiB, ~24 MiB on v7x's 64 MiB).
_SINGLE_BLOCK_BYTES = (_VMEM_CAP * 3) // 8


# --------------------------------------------------------------- kernels
def _single_kernel(D, params_ref, z_ref, z0_ref, f_ref, logdet_ref):
    """Gridless single-block kernel (whole array VMEM-resident, z aliased to f)."""
    z = z_ref[...]                                   # (R, L) f32
    z_sub = z - z0_ref[...]                          # z0 (1, L) broadcast
    r = jnp.sqrt(jnp.sum(z_sub * z_sub))             # global Frobenius norm -> scalar
    log_alpha = params_ref[0]
    beta = params_ref[1]
    alpha = jnp.exp(log_alpha)
    h = 1.0 / (alpha + r)
    bh = beta * h
    f_ref[...] = z + bh * z_sub
    # beta*r/(alpha+r)**2 rewritten as beta*r*h*h (no pow, no second divide).
    logdet_ref[0] = (D - 1) * jnp.log(1.0 + bh) + jnp.log(
        1.0 + bh + beta - beta * r * h * h)


def _reduce_kernel(R, tile_rows, z_ref, z0_ref, psum_ref):
    """Per-tile partial sum of ||z - z0||^2 (grid axis is 'parallel')."""
    zs = z_ref[...] - z0_ref[...]
    if R % tile_rows != 0:
        # Last tile overlaps the array boundary; Pallas pads the read with garbage rows,
        # so mask them out of the reduction (static decision: only emitted when ragged).
        row = pl.program_id(0) * tile_rows + jax.lax.broadcasted_iota(
            jnp.int32, zs.shape, 0)
        zs = jnp.where(row < R, zs, 0.0)
    # Broadcast the tile's scalar into a (8,128)-aligned slab; wrapper reads [:, 0, 0].
    psum_ref[0] = jnp.full((8, _LANE), jnp.sum(zs * zs), dtype=jnp.float32)


def _apply_kernel(bh_ref, z_ref, z0_ref, f_ref):
    """f = z + bh * (z - z0), bh precomputed (scalar prefetch); grid axis 'parallel'."""
    z = z_ref[...]
    f_ref[...] = z + bh_ref[0] * (z - z0_ref[...])


# --------------------------------------------------------------- layout helpers
def _lane_dense(z, z0):
    """Present z/z0 lane-dense when it is FREE (pure reshape); never pad/copy."""
    B, D = z.shape
    if D % _LANE == 0:
        return z, z0.reshape(1, D), ("same", B, D)
    if (_LANE % D == 0) and ((B * D) % _LANE == 0):
        rep = _LANE // D
        zl = z.reshape((B * D) // _LANE, _LANE)          # contiguous reshape: no copy
        z0l = jnp.tile(z0, rep).reshape(1, _LANE)        # tiny (<= 512 B)
        return zl, z0l, ("reshape", B, D)
    # Natural layout: last block dim equals the full array dim (allowed by BlockSpec),
    # stores are lane-masked but there is zero extra HBM traffic from pad/slice copies.
    return z, z0.reshape(1, D), ("same", B, D)


def _restore(f_l, mode):
    kind, B, D = mode
    if kind == "reshape":
        return f_l.reshape(B, D)
    return f_l


def _pick_tile_rows(R, L, tile_rows):
    """~4 MiB row tiles (multiple of 8); whole array if it fits in one tile."""
    if tile_rows is None:
        tile_rows = max(8, ((4 << 20) // (L * 4)) // 8 * 8)
    else:
        tile_rows = max(8, (tile_rows // 8) * 8)
    if tile_rows >= R:
        return R                      # single tile: block == full array rows
    return tile_rows


# --------------------------------------------------------------- pallas_call wrappers
def _radial_flow_single(params, z_l, z0_l, D, nbytes):
    R, L = z_l.shape
    vmem_limit = max(16 << 20, min(int(_VMEM_CAP * 0.9), 2 * nbytes + (4 << 20)))
    return pl.pallas_call(
        functools.partial(_single_kernel, D),
        out_shape=(
            jax.ShapeDtypeStruct((R, L), jnp.float32),   # f
            jax.ShapeDtypeStruct((1,), jnp.float32),     # log_det
        ),
        in_specs=[
            pl.BlockSpec(memory_space=pltpu.SMEM),       # params (2,) = [log_alpha, beta]
            pl.BlockSpec(memory_space=pltpu.VMEM),       # z (R, L)
            pl.BlockSpec(memory_space=pltpu.VMEM),       # z0 (1, L)
        ],
        out_specs=(
            pl.BlockSpec(memory_space=pltpu.VMEM),
            pl.BlockSpec(memory_space=pltpu.SMEM),
        ),
        # z's HBM buffer reused for f (callers should donate z to realize the benefit).
        input_output_aliases={1: 0},
        compiler_params=pltpu.CompilerParams(vmem_limit_bytes=vmem_limit),
    )(params, z_l, z0_l)


def _radial_flow_tiled(z_l, z0_l, log_alpha, beta, D, tile_rows):
    R, L = z_l.shape
    tile_rows = _pick_tile_rows(R, L, tile_rows)
    ntiles = -(-R // tile_rows)
    tile_bytes = tile_rows * L * 4
    # 2 z-in windows + 2 f-out windows double buffered, plus slack; capped per generation.
    vmem_limit = max(32 << 20, min(int(_VMEM_CAP * 0.9), 4 * tile_bytes + (8 << 20)))

    # --- Kernel 1: parallel per-tile partial sums of ||z - z0||^2 ------------------
    psum = pl.pallas_call(
        functools.partial(_reduce_kernel, R, tile_rows),
        out_shape=jax.ShapeDtypeStruct((ntiles, 8, _LANE), jnp.float32),
        grid=(ntiles,),
        in_specs=[
            pl.BlockSpec((tile_rows, L), lambda i: (i, 0)),
            pl.BlockSpec((1, L), lambda i: (0, 0)),
        ],
        out_specs=pl.BlockSpec((1, 8, _LANE), lambda i: (i, 0, 0)),
        compiler_params=pltpu.CompilerParams(
            dimension_semantics=("parallel",),
            vmem_limit_bytes=vmem_limit,
        ),
    )(z_l, z0_l)
    ssq = jnp.sum(psum[:, 0, 0])          # tiny pairwise XLA reduce (ntiles scalars)

    # --- Scalar epilogue (hoisted: sqrt/exp/recip once, not per tile) --------------
    r = jnp.sqrt(ssq)
    alpha = jnp.exp(log_alpha)            # (1,)
    h = 1.0 / (alpha + r)
    bh = beta * h                         # (1,)
    log_det = (D - 1) * jnp.log(1.0 + bh) + jnp.log(
        1.0 + bh + beta - beta * r * h * h)

    # --- Kernel 2: parallel apply f = z + bh * (z - z0) ----------------------------
    f = pl.pallas_call(
        _apply_kernel,
        out_shape=jax.ShapeDtypeStruct((R, L), jnp.float32),
        grid_spec=pltpu.PrefetchScalarGridSpec(
            num_scalar_prefetch=1,                         # bh -> SMEM scalar
            grid=(ntiles,),
            in_specs=[
                pl.BlockSpec((tile_rows, L), lambda i, bh: (i, 0)),
                pl.BlockSpec((1, L), lambda i, bh: (0, 0)),
            ],
            out_specs=pl.BlockSpec((tile_rows, L), lambda i, bh: (i, 0)),
        ),
        compiler_params=pltpu.CompilerParams(
            dimension_semantics=("parallel",),
            vmem_limit_bytes=vmem_limit,
        ),
    )(bh.reshape(-1).astype(jnp.float32), z_l, z0_l)
    return f, log_det.reshape(1)


@functools.partial(jax.jit, static_argnames=("single_block_bytes", "tile_rows"))
def radial_flow(z, z0, log_alpha, beta, *, single_block_bytes=None, tile_rows=None):
    """z: (B, D) f32; z0: (D,) f32; log_alpha, beta: (1,) f32 -> (f (B, D), log_det (1,))."""
    z = z.astype(jnp.float32)
    z0 = z0.astype(jnp.float32)
    log_alpha = jnp.reshape(log_alpha, (-1,)).astype(jnp.float32)
    beta = jnp.reshape(beta, (-1,)).astype(jnp.float32)
    _, D = z.shape
    if single_block_bytes is None:
        single_block_bytes = _SINGLE_BLOCK_BYTES

    z_l, z0_l, mode = _lane_dense(z, z0)
    nbytes = z_l.shape[0] * z_l.shape[1] * 4
    if nbytes <= single_block_bytes:
        params = jnp.concatenate([log_alpha, beta])                 # (2,)
        f_l, log_det = _radial_flow_single(params, z_l, z0_l, D, nbytes)
    else:
        f_l, log_det = _radial_flow_tiled(z_l, z0_l, log_alpha, beta, D, tile_rows)
    return _restore(f_l, mode), log_det


# --------------------------------------------------------------- pure-JAX reference
def radial_flow_ref(z, z0, log_alpha, beta):
    D = z.shape[-1]
    z_sub = z - z0
    alpha = jnp.exp(log_alpha)
    r = jnp.sqrt(jnp.sum(z_sub * z_sub))
    h = 1.0 / (alpha + r)
    f = z + beta * h * z_sub
    log_det = (D - 1) * jnp.log(1.0 + beta * h) + jnp.log(
        1.0 + beta * h + beta - beta * r / (alpha + r) ** 2
    )
    return f, log_det


if __name__ == "__main__":
    key = jax.random.PRNGKey(0)
    k_z, k_z0, k_la, k_b = jax.random.split(key, 4)

    # Small shape consistent with the module (B=8 samples, D=32 features).
    B, D = 8, 32
    z = jax.random.normal(k_z, (B, D), dtype=jnp.float32)
    z0 = jax.random.normal(k_z0, (D,), dtype=jnp.float32)
    log_alpha = jax.random.normal(k_la, (1,), dtype=jnp.float32)
    beta = jax.random.normal(k_b, (1,), dtype=jnp.float32)

    # 1) single-block path (lane-dense reshape (8,32)->(2,128), z aliased to f).
    f, log_det = radial_flow(z, z0, log_alpha, beta)
    jax.block_until_ready((f, log_det))
    f_ref, ld_ref = radial_flow_ref(z, z0, log_alpha, beta)
    assert f.shape == (B, D) and log_det.shape == (1,)
    assert jnp.allclose(f, f_ref, atol=1e-5, rtol=1e-5)
    assert jnp.allclose(log_det, ld_ref, atol=1e-5, rtol=1e-5)

    # 2) split reduce/apply tiled path (forced): lane-dense reshape (128,32)->(32,128),
    #    8-row tiles, 4 'parallel' grid steps per kernel.
    B2, D2 = 128, 32
    z2 = jax.random.normal(jax.random.PRNGKey(1), (B2, D2), dtype=jnp.float32)
    f2, log_det2 = radial_flow(z2, z0, log_alpha, beta,
                               single_block_bytes=0, tile_rows=8)
    jax.block_until_ready((f2, log_det2))
    f2_ref, ld2_ref = radial_flow_ref(z2, z0, log_alpha, beta)
    assert f2.shape == (B2, D2) and log_det2.shape == (1,)
    assert jnp.allclose(f2, f2_ref, atol=1e-4, rtol=1e-4)
    assert jnp.allclose(log_det2, ld2_ref, atol=1e-4, rtol=1e-4)

    # 3) ragged + non-lane-dense tiled path (forced): D=48 (no reshape/pad), R=100 with
    #    8-row tiles -> ragged last tile exercises the in-kernel row mask and masked
    #    boundary writeback; no wrapper-side pad/concat/slice copies involved.
    B3, D3 = 100, 48
    z3 = jax.random.normal(jax.random.PRNGKey(2), (B3, D3), dtype=jnp.float32)
    z03 = jax.random.normal(jax.random.PRNGKey(3), (D3,), dtype=jnp.float32)
    f3, log_det3 = radial_flow(z3, z03, log_alpha, beta,
                               single_block_bytes=0, tile_rows=8)
    jax.block_until_ready((f3, log_det3))
    f3_ref, ld3_ref = radial_flow_ref(z3, z03, log_alpha, beta)
    assert f3.shape == (B3, D3) and log_det3.shape == (1,)
    assert jnp.allclose(f3, f3_ref, atol=1e-4, rtol=1e-4)
    assert jnp.allclose(log_det3, ld3_ref, atol=1e-4, rtol=1e-4)

    print("KERNEL_OK")
</pallas_src>

<mosaic_0001>
module attributes {stable_mosaic.version = 11 : i64} {
  func.func @_single_kernel(%arg0: memref<2xf32, #tpu.memory_space<smem>>, %arg1: memref<2x128xf32, #tpu.memory_space<vmem>>, %arg2: memref<1x128xf32, #tpu.memory_space<vmem>>, %arg3: memref<2x128xf32, #tpu.memory_space<vmem>>, %arg4: memref<1xf32, #tpu.memory_space<smem>>) attributes {dimension_semantics = [], scalar_prefetch = 0 : i64, scratch_operands = 0 : i64, tpu.core_type = #tpu.core_type<tc>} {
    %c0 = arith.constant 0 : index
    %c0_0 = arith.constant 0 : index
    %0 = vector.load %arg1[%c0, %c0_0] : memref<2x128xf32, #tpu.memory_space<vmem>>, vector<2x128xf32>
    %c0_1 = arith.constant 0 : index
    %c0_2 = arith.constant 0 : index
    %1 = vector.load %arg2[%c0_1, %c0_2] : memref<1x128xf32, #tpu.memory_space<vmem>>, vector<1x128xf32>
    %2 = vector.broadcast %1 : vector<1x128xf32> to vector<2x128xf32>
    %3 = arith.subf %0, %2 : vector<2x128xf32>
    %4 = arith.mulf %3, %3 : vector<2x128xf32>
    %5 = vector.shape_cast %4 : vector<2x128xf32> to vector<1x2x128xf32>
    %cst = arith.constant dense<0.000000e+00> : vector<1xf32>
    %6 = vector.multi_reduction <add>, %5, %cst [1, 2] : vector<1x2x128xf32> to vector<1xf32>
    %7 = vector.shape_cast %6 : vector<1xf32> to vector<1x1x1xf32>
    %8 = vector.extract %7[0, 0, 0] : f32 from vector<1x1x1xf32>
    %9 = math.sqrt %8 : f32
    %c0_3 = arith.constant 0 : index
    %10 = memref.load %arg0[%c0_3] : memref<2xf32, #tpu.memory_space<smem>>
    %c1 = arith.constant 1 : index
    %11 = memref.load %arg0[%c1] : memref<2xf32, #tpu.memory_space<smem>>
    %12 = math.exp %10 : f32
    %13 = arith.addf %12, %9 : f32
    %cst_4 = arith.constant 1.000000e+00 : f32
    %14 = arith.divf %cst_4, %13 : f32
    %15 = arith.mulf %11, %14 : f32
    %16 = vector.broadcast %15 : f32 to vector<2x128xf32>
    %17 = arith.mulf %16, %3 : vector<2x128xf32>
    %18 = arith.addf %0, %17 : vector<2x128xf32>
    %c0_5 = arith.constant 0 : index
    %c0_6 = arith.constant 0 : index
    %19 = vector.load %arg3[%c0_5, %c0_6] : memref<2x128xf32, #tpu.memory_space<vmem>>, vector<2x128xf32>
    tpu.vector_store %arg3[%c0_5, %c0_6], %18 {strides = array<i32>} : memref<2x128xf32, #tpu.memory_space<vmem>>, vector<2x128xf32>,
    %cst_7 = arith.constant 1.000000e+00 : f32
    %20 = arith.addf %cst_7, %15 : f32
    %21 = math.log %20 : f32
    %cst_8 = arith.constant 3.100000e+01 : f32
    %22 = arith.mulf %cst_8, %21 : f32
    %cst_9 = arith.constant 1.000000e+00 : f32
    %23 = arith.addf %cst_9, %15 : f32
    %24 = arith.addf %23, %11 : f32
    %25 = arith.mulf %11, %9 : f32
    %26 = arith.mulf %25, %14 : f32
    %27 = arith.mulf %26, %14 : f32
    %28 = arith.subf %24, %27 : f32
    %29 = math.log %28 : f32
    %30 = arith.addf %22, %29 : f32
    %c0_10 = arith.constant 0 : index
    %31 = memref.load %arg4[%c0_10] : memref<1xf32, #tpu.memory_space<smem>>
    memref.store %30, %arg4[%c0_10] : memref<1xf32, #tpu.memory_space<smem>>
    return
  }
}

</mosaic_0001>

<bundles_post_ra>
// kernel: tile.9
= control target key start
LH: loop header
LB: loop body
LE: loop exit
PB: predicated region body
PF: predicated region fallthrough
CT: control target
= control target key end

     0   :  { %s37_s8 = smov 32   ;;  %s38_s9 = smov 64   ;;  %vm7_vm0 = vcmask 261120   ;;  %vm13_vm1 = vcmask 1048320   ;;  %vm19_vm2 = vcmask 785920   ;;  %vm25_vm3 = vcmask 523520   ;;  %s55_s0 = inlined_call_operand.vmem [shape: f32[4,32], index: 0, kind: input, shape index: {}]   ;;  %s56_s1 = inlined_call_operand.vmem [shape: f32[1,128], index: 1, kind: output, shape index: {}]  }
   0x1   :  { %v4_v0 = vld [vmem:[%s55_s0] sm:$0xf]  ;;  %s36_s0 = smov 96  }
   0x2   :  { %5 = vst [vmem:[#allocation1] sm:$0xf] %v4_v0 }
   0x9   :  { %v10_v1 = vld [vmem:[#allocation1 + $0x3] sm:$0x1]   ;;  %v22_v2 = vld [vmem:[#allocation1 + $0x1] sm:$0x1]   ;;  %v16_v3 = vld [vmem:[#allocation1 + $0x2] sm:$0x1]  }
   0xa   :  { %11 = vrot.lane.b32.xlu0 %v10_v1, %s36_s0  ;;  %23 = vrot.lane.b32.xlu1 %v22_v2, %s37_s8  ;;  %v6_v4 = vld [vmem:[#allocation1] sm:$0x1]  }
   0xb   :  { %8 = vst.msk [vmem:[#allocation0] sm:$0x1] %vm7_vm0, %v6_v4  }
  0x12   :  { %17 = vrot.lane.b32.xlu0 %v16_v3, %s38_s9 }
  0x7c   :  { %v12_v5 = vpop.permute.xlu0 %11   ;;  %v24_v6 = vpop.permute.xlu1 %23  }
  0x7d   :  { %14 = vst.msk [vmem:[#allocation0] sm:$0x1] %vm13_vm1, %v12_v5  }
  0x84   :  { %v18_v7 = vpop.permute.xlu0 %17  }
  0x85   :  { %20 = vst.msk [vmem:[#allocation0] sm:$0x1] %vm19_vm2, %v18_v7  }
  0x86   :  { %26 = vst.msk [vmem:[#allocation0] sm:$0x1] %vm25_vm3, %v24_v6  }
  0x8d   :  { %v29_v8 = vld [vmem:[#allocation0] sm:$0x1] }
  0x8e   :  { %32 = vst [vmem:[%s56_s1] sm:$0x1] %v29_v8 }

// kernel: tile.8
= control target key start
LH: loop header
LB: loop body
LE: loop exit
PB: predicated region body
PF: predicated region fallthrough
CT: control target
= control target key end

     0   :  { %s22_s0 = inlined_call_operand.vmem [shape: f32[32], index: 0, kind: input, shape index: {}]   ;;  %s23_s1 = inlined_call_operand.vmem [shape: f32[4,32], index: 1, kind: output, shape index: {}]  }
   0x1   :  { %v4_v0 = vld [vmem:[%s22_s0] ss:$0 sm:$0xff] }
   0x2   :  { %5 = vst [vmem:[%s23_s1] sm:$0xf] %v4_v0 }

// kernel: radial_flow.1
= control target key start
LH: loop header
LB: loop body
LE: loop exit
PB: predicated region body
PF: predicated region fallthrough
CT: control target
= control target key end

     0   :  { %10 = vsyncpa [#allocation4], 0  ;;  %s228_s0 = inlined_call_operand.vmem [shape: f32[2], index: 0, kind: input, shape index: {}]   ;;  %s229_s1 = inlined_call_operand.vmem [shape: f32[2,128], index: 1, kind: input, shape index: {}, may-alias: {1,3}]   ;;  %s230_s2 = inlined_call_operand.vmem [shape: f32[1,128], index: 2, kind: input, shape index: {}]   ;;  %s231_s3 = inlined_call_operand.vmem [shape: f32[2,128], index: 3, kind: output, shape index: {0}, may-alias: {1,3}]   ;;  %s232_s4 = inlined_call_operand.hbm [shape: f32[1], index: 4, kind: output, shape index: {1}]  }
   0x1   :  { %11 = vsyncpa [#allocation3], 0  ;;  %s17_s17 = sshll.u32 %s228_s0, 4  ;;  %s182_s18 = smov [#allocation2]   ;;  %s18_s17 = int_to_ptr.vmem [resolvable:$true] %s17_s17 }
   0x2   :  { %20 = dma.vmem_to_smem %s18_s17, 16, %s182_s18, [#allocation4]  }
   0x3   :  { %178 = dma.done.wait [#allocation4], 16  }
   0x4   :  { %179 = vsyncadd [#allocation4], 4294967280 }
   0x5   :  { %29 = sfence }
   0x6   :  { %v215_v0 = vld [vmem:[%s229_s1] sm:$0x3]  ;;  %vm37_vm0 = vcmask 1041408   ;;  %s62_s1 = sld [smem:[#allocation2]]  ;;  %s115_s13 = sshll.u32 %s232_s4, 4  ;;  %s116_s13 = int_to_ptr.hbm [resolvable:$true] %s115_s13 }
   0x7   :  { %v143_v1 = vld [vmem:[%s230_s2] ss:$0 sm:$0xff]  ;;  %s128_s25 = sld [smem:[#allocation2 + $0x1]]  ;;  %s183_s17 = smov [#allocation5]  }
   0x8   :  { %v35_v2 = vsub.f32 %v215_v0, %v143_v1 }
   0xa   :  { %v36_v3 = vmul.f32 %v35_v2, %v35_v2 }
   0xc   :  { %v38_v4 = vsel %vm37_vm0, %v36_v3, 0.0  ;;  %v64_v14 = vstv %s62_s1 }
   0xd   :  { %39 = vadd.xlane.f32.xlu0 %v38_v4  ;;  %v65_v17 = vmul.f32 1.442695, %v64_v14 }
  0x80   :  { %v40_v5 = vpop.xlane.xlu0 %39 }
  0x81   :  { %v41_v6 = vrot.slane %v40_v5, 4 }
  0x83   :  { %v42_v7 = vadd.f32 %v41_v6, %v40_v5 }
  0x85   :  { %v43_v8 = vrot.slane %v42_v7, 2 }
  0x87   :  { %v44_v9 = vadd.f32 %v43_v8, %v42_v7 }
  0x89   :  { %v45_v10 = vrot.slane %v44_v9, 1 }
  0x8b   :  { %v46_v11 = vadd.f32 %v45_v10, %v44_v9 }
  0x8d   :  { %129 = vpush %v46_v11 }
  0xbe   :  { %s130_s0 = spop %129 }
  0xbf   :  { %v48_v12 = vstv %s130_s0 }
  0xc0   :  { %144 = vrsqrt.f32 %v48_v12  ;;  %vm56_vm1 = vcmp.eq.f32.partialorder %v48_v12, inf  ;;  %v59_v22 = vand.u32 2147483648, %v48_v12  ;;  %vm58_vm2 = vcmp.eq.f32.partialorder %v48_v12, 0.0 }
  0xc1   :  { %146 = vpow2.f32 %v65_v17 }
  0xc6   :  { %v145_v13 = vpop.eup %144 }
  0xc7   :  { %v50_v15 = vmul.f32 %v145_v13, %v48_v12  ;;  %v147_v23 = vpop.eup %146 }
  0xc9   :  { %v51_v16 = vmul.f32 %v145_v13, %v50_v15 }
  0xcb   :  { %v52_v18 = vmul.f32 0.5, %v51_v16 }
  0xcd   :  { %v53_v19 = vsub.f32 1.5, %v52_v18 }
  0xcf   :  { %v54_v20 = vmul.f32 %v145_v13, %v53_v19 }
  0xd1   :  { %v55_v21 = vmul.f32 %v54_v20, %v48_v12 }
  0xd3   :  { %v57_v24 = vsel %vm56_vm1, %v48_v12, %v55_v21 }
  0xd4   :  { %v60_v25 = vsel %vm58_vm2, %v59_v22, %v57_v24 }
  0xd5   :  { %131 = vpush %v60_v25 }
  0xd6   :  { %133 = vpush %v147_v23 }
 0x106   :  { %s132_s2 = spop %131 }
 0x107   :  { %s134_s23 = spop %133  ;;  %s97_s26 = smul.f32 %s132_s2, %s128_s25 }
 0x108   :  { %s68_s24 = sadd.f32 %s134_s23, %s132_s2 }
 0x10a   :  { %v69_v26 = vstv %s68_s24 }
 0x10b   :  { %148 = vrcp.f32 %v69_v26  ;;  %v81_v30 = vand.u32 2147483648, %v69_v26  ;;  %v79_v32 = vand.u32 2147483647, %v69_v26  ;;  %vm75_vm4 = vweird.f32 %v69_v26 }
 0x10d   :  { %v82_v34 = vor.u32 1.1754944e-38, %v81_v30  ;;  %vm80_vm6 = vcmp.eq.f32.partialorder %v79_v32, 8.507059e+37 }
 0x111   :  { %v149_v27 = vpop.eup %148 }
 0x112   :  { %v71_v28 = vmul.f32 %v149_v27, %v69_v26  ;;  %vm76_vm3 = vweird.f32 %v149_v27 }
 0x113   :  { %vm77_vm5 = vmor %vm75_vm4, %vm76_vm3 }
 0x114   :  { %v72_v29 = vsub.f32 1.0, %v71_v28 }
 0x116   :  { %v73_v31 = vmul.f32 %v149_v27, %v72_v29 }
 0x118   :  { %v74_v33 = vadd.f32 %v149_v27, %v73_v31 }
 0x11a   :  { %v78_v35 = vsel %vm77_vm5, %v149_v27, %v74_v33 }
 0x11b   :  { %v83_v36 = vsel %vm80_vm6, %v82_v34, %v78_v35 }
 0x11c   :  { %135 = vpush %v83_v36 }
 0x14d   :  { %s136_s27 = spop %135 }
 0x14e   :  { %s85_s28 = smul.f32 %s136_s27, %s128_s25 }
 0x14f   :  { %s98_s29 = smul.f32 %s136_s27, %s97_s26 }
 0x150   :  { %v86_v37 = vstv %s85_s28  ;;  %s90_s30 = sadd.f32 1.0, %s85_s28 }
 0x151   :  { %v87_v38 = vmul.f32 %v86_v37, %v35_v2  ;;  %s99_s5 = smul.f32 %s136_s27, %s98_s29 }
 0x152   :  { %v91_v39 = vstv %s90_s30  ;;  %s96_s6 = sadd.f32 %s128_s25, %s90_s30 }
 0x153   :  { %v88_v40 = vadd.f32 %v87_v38, %v215_v0  ;;  %150 = vlog2.f32 %v91_v39 }
 0x154   :  { %s100_s7 = ssub.f32 %s96_s6, %s99_s5 }
 0x155   :  { %89 = vst [vmem:[%s231_s3] sm:$0x3] %v88_v40 }
 0x156   :  { %v101_v41 = vstv %s100_s7 }
 0x157   :  { %152 = vlog2.f32 %v101_v41 }
 0x159   :  { %v151_v42 = vpop.eup %150 }
 0x15a   :  { %v93_v43 = vmul.f32 0.6931472, %v151_v42 }
 0x15c   :  { %137 = vpush %v93_v43 }
 0x15d   :  { %v153_v44 = vpop.eup %152 }
 0x15e   :  { %v103_v45 = vmul.f32 0.6931472, %v153_v44 }
 0x160   :  { %139 = vpush %v103_v45 }
 0x18d   :  { %s138_s10 = spop %137 }
 0x18e   :  { %s95_s14 = smul.f32 31.0, %s138_s10 }
 0x191   :  { %s140_s15 = spop %139 }
 0x192   :  { %s105_s16 = sadd.f32 %s140_s15, %s95_s14 }
 0x194   :  { %107 = sst [smem:[#allocation5]] %s105_s16 }
 0x195   :  { %118 = dma.smem_to_hbm %s183_s17, 16, %s116_s13, [#allocation3]  }
 0x196   :  { %180 = dma.done.wait [#allocation3], 16  }
 0x197   :  { %181 = vsyncadd [#allocation3], 4294967280 }
 0x198   :  { %125 = sfence }
 0x199   :  { %126 = vsyncpa [#allocation3], 1 }
 0x19a   :  { %127 = vsyncpa [#allocation4], 1 }

</bundles_post_ra>
